<compile_context>
chip_gen: v7x
topology: tpu7x:2x2x1
jax: 0.10.0
libtpu: 0.0.40
codegen_flags: <defaults>
</compile_context>

<pallas_src>
import jax
import jax.numpy as jnp
from jax.experimental import pallas as pl
from jax.experimental.pallas import tpu as pltpu

_LANE = 128
_SUBLANE_F32 = 8


def _round_up(n, m):
    return ((n + m - 1) // m) * m


def _leaky_relu(x, negative_slope=0.01):
    return jnp.where(x > 0, x, negative_slope * x)


# --------------------------------------------------------------------------- #
# Kernel
# --------------------------------------------------------------------------- #
def classifier_kernel(x_ref, w1_ref, b1_ref, w2_ref, b2_ref, w3_ref, b3_ref,
                      o_ref):
    """Fused 3-layer MLP: FC+LeakyReLU -> GroupFC+LeakyReLU -> GroupFC."""
    # lin1: dense FC. x arrives as raw f32 tile; cast to compute dtype in-kernel.
    x = x_ref[...].astype(w1_ref.dtype)
    h1 = jnp.dot(x, w1_ref[...], preferred_element_type=jnp.float32)
    h1 = _leaky_relu(h1 + b1_ref[...])

    # lin2: GroupFC (block-diagonal weights) + LeakyReLU
    h2 = jnp.dot(h1.astype(w2_ref.dtype), w2_ref[...],
                 preferred_element_type=jnp.float32)
    h2 = _leaky_relu(h2 + b2_ref[...])

    # lin3: GroupFC (block-diagonal weights) + Identity
    o = jnp.dot(h2.astype(w3_ref.dtype), w3_ref[...],
                preferred_element_type=jnp.float32)
    o_ref[...] = (o + b3_ref[...]).astype(o_ref.dtype)


# --------------------------------------------------------------------------- #
# One-time parameter preparation (hoisted out of the per-call path)
# --------------------------------------------------------------------------- #
def prepare_params(params, compute_dtype=jnp.bfloat16):
    """Pad hidden dim to a 128-lane multiple and cast weights to compute_dtype.

    Padded hidden lanes stay exactly 0 through bias-add/LeakyReLU (padded bias
    columns are 0) and contribute nothing downstream (padded weight rows are 0),
    so semantics are unchanged. input_dim / output_dim are left unpadded — the
    kernel blocks cover their full extents and the MXU pads K/N internally.
    Biases stay f32 (bias-add / LeakyReLU run in f32; safe on v5e's f32-only VPU).
    """
    w1, b1, w2, b2, w3, b3 = params
    hidden_dim = w1.shape[1]
    dh = _round_up(hidden_dim, _LANE) - hidden_dim

    w1p = jnp.pad(w1, ((0, 0), (0, dh))).astype(compute_dtype)
    b1p = jnp.pad(b1, ((0, 0), (0, dh))).astype(jnp.float32)
    w2p = jnp.pad(w2, ((0, dh), (0, dh))).astype(compute_dtype)
    b2p = jnp.pad(b2, ((0, 0), (0, dh))).astype(jnp.float32)
    w3p = jnp.pad(w3, ((0, dh), (0, 0))).astype(compute_dtype)
    b3p = b3.astype(jnp.float32)
    return (w1p, b1p, w2p, b2p, w3p, b3p)


# --------------------------------------------------------------------------- #
# Wrapper
# --------------------------------------------------------------------------- #
def _vmem_limit_bytes():
    """Generation-aware VMEM limit: 75% of physical per-core VMEM, <= 100 MiB."""
    try:
        cap = pltpu.get_tpu_info().vmem_capacity_bytes
    except Exception:
        cap = 64 << 20   # conservative fallback (v7x physical size)
    return int(min(cap * 3 // 4, 100 << 20))


def _pick_batch_tile(B, max_tile=512):
    """Largest sublane-aligned divisor of B (<= max_tile), preferring grid >= 2
    so the 'parallel' batch axis can shard across v7x's two TensorCores."""
    cands = [bt for bt in range(_SUBLANE_F32, min(B, max_tile) + 1, _SUBLANE_F32)
             if B % bt == 0]
    if not cands:
        return B
    multi = [bt for bt in cands if B // bt >= 2]
    return max(multi) if multi else max(cands)


def naive_parameters_classifier(x, prepared_params, *, batch_tile=None,
                                single_buffer_weights=True):
    """x: [B, input_dim] float32; prepared_params from prepare_params().
    Returns [B, output_dim] float32."""
    w1p, b1p, w2p, b2p, w3p, b3p = prepared_params
    B, input_dim = x.shape
    assert w1p.shape[0] == input_dim, "prepared params do not match input_dim"
    h_pad = w1p.shape[1]
    output_dim = w3p.shape[1]

    bt = batch_tile if batch_tile is not None else _pick_batch_tile(B)
    assert B % bt == 0, f"batch {B} must be divisible by batch_tile {bt}"
    assert bt == B or bt % _SUBLANE_F32 == 0, (
        f"batch_tile {bt} must be a multiple of {_SUBLANE_F32} (or equal batch {B})")
    grid = (B // bt,)

    w_itemsize = jnp.dtype(w1p.dtype).itemsize
    cost = pl.CostEstimate(
        flops=int(2 * B * (input_dim * h_pad + h_pad * h_pad + h_pad * output_dim)),
        transcendentals=0,
        bytes_accessed=int(
            B * input_dim * 4 + B * output_dim * 4
            + (w1p.size + w2p.size + w3p.size) * w_itemsize
            + (b1p.size + b2p.size + b3p.size) * 4))

    def build(weight_mode):
        def wspec(shape):
            # grid-invariant operands: constant index_map, optionally single-buffered
            if weight_mode is None:
                return pl.BlockSpec(shape, lambda i: (0, 0))
            return pl.BlockSpec(shape, lambda i: (0, 0), pipeline_mode=weight_mode)

        return pl.pallas_call(
            classifier_kernel,
            out_shape=jax.ShapeDtypeStruct((B, output_dim), jnp.float32),
            grid_spec=pltpu.PrefetchScalarGridSpec(
                num_scalar_prefetch=0,
                grid=grid,
                in_specs=[
                    pl.BlockSpec((bt, input_dim), lambda i: (i, 0)),  # x (raw f32)
                    wspec((input_dim, h_pad)),                        # W1
                    wspec((1, h_pad)),                                # b1
                    wspec((h_pad, h_pad)),                            # W2 (block-diag)
                    wspec((1, h_pad)),                                # b2
                    wspec((h_pad, output_dim)),                       # W3 (block-diag)
                    wspec((1, output_dim)),                           # b3
                ],
                out_specs=pl.BlockSpec((bt, output_dim), lambda i: (i, 0)),
            ),
            compiler_params=pltpu.CompilerParams(
                dimension_semantics=("parallel",),
                vmem_limit_bytes=_vmem_limit_bytes()),
            cost_estimate=cost,
        )

    args = (x, w1p, b1p, w2p, b2p, w3p, b3p)
    if single_buffer_weights:
        try:
            return build(pl.Buffered(1))(*args)
        except Exception:
            pass   # fall back to default double-buffered weights
    return build(None)(*args)


# --------------------------------------------------------------------------- #
# Init + reference (plain JAX)
# --------------------------------------------------------------------------- #
def init_params(key, division, input_dim, hidden_dim_per_group):
    """Deterministic PyTorch-Linear-style init (U(-1/sqrt(fan_in), 1/sqrt(fan_in)))."""
    n_groups = len(division)
    hidden_dim = hidden_dim_per_group * n_groups
    output_dim = sum(division)

    def uniform(k, shape, fan_in):
        bound = 1.0 / jnp.sqrt(jnp.float32(fan_in))
        return jax.random.uniform(k, shape, jnp.float32, -bound, bound)

    keys = jax.random.split(key, 6 + 4 * n_groups)
    ki = iter(range(len(keys)))

    # lin1: dense [input_dim, hidden_dim] (already transposed vs. torch)
    w1 = uniform(keys[next(ki)], (input_dim, hidden_dim), input_dim)
    b1 = uniform(keys[next(ki)], (1, hidden_dim), input_dim)

    # lin2: GroupFC 64->64 per group -> block-diagonal [hidden, hidden]
    w2 = jnp.zeros((hidden_dim, hidden_dim), jnp.float32)
    b2_parts = []
    for g in range(n_groups):
        wg = uniform(keys[next(ki)],
                     (hidden_dim_per_group, hidden_dim_per_group),
                     hidden_dim_per_group)
        bg = uniform(keys[next(ki)], (hidden_dim_per_group,),
                     hidden_dim_per_group)
        s = g * hidden_dim_per_group
        w2 = w2.at[s:s + hidden_dim_per_group, s:s + hidden_dim_per_group].set(wg)
        b2_parts.append(bg)
    b2 = jnp.concatenate(b2_parts)[None, :]

    # lin3: GroupFC 64->division[g] per group -> block-diagonal [hidden, output]
    w3 = jnp.zeros((hidden_dim, output_dim), jnp.float32)
    b3_parts = []
    col = 0
    for g, out_g in enumerate(division):
        wg = uniform(keys[next(ki)], (hidden_dim_per_group, out_g),
                     hidden_dim_per_group)
        bg = uniform(keys[next(ki)], (out_g,), hidden_dim_per_group)
        s = g * hidden_dim_per_group
        w3 = w3.at[s:s + hidden_dim_per_group, col:col + out_g].set(wg)
        b3_parts.append(bg)
        col += out_g
    b3 = jnp.concatenate(b3_parts)[None, :]

    return (w1, b1, w2, b2, w3, b3)


def reference_forward(x, params, compute_dtype=jnp.float32):
    """Plain-JAX reference (same math as the PyTorch module), optionally with
    the same bf16-inputs / f32-accumulation scheme as the kernel."""
    w1, b1, w2, b2, w3, b3 = params
    cd = compute_dtype
    h1 = _leaky_relu(
        jnp.dot(x.astype(cd), w1.astype(cd),
                preferred_element_type=jnp.float32) + b1)
    h2 = _leaky_relu(
        jnp.dot(h1.astype(cd), w2.astype(cd),
                preferred_element_type=jnp.float32) + b2)
    return jnp.dot(h2.astype(cd), w3.astype(cd),
                   preferred_element_type=jnp.float32) + b3


# --------------------------------------------------------------------------- #
# Test
# --------------------------------------------------------------------------- #
if __name__ == "__main__":
    # Small shapes consistent with the module:
    #   division=(8, 8) -> output_dim=16 ; hidden_dim_per_group=64 -> hidden_dim=128
    #   input_dim=32, batch=64 -> auto batch_tile=32, grid=(2,) (real pipelining /
    #   megacore-shardable parallel axis)
    division = (8, 8)
    input_dim = 32
    hidden_dim_per_group = 64
    batch = 64

    key = jax.random.PRNGKey(0)
    k_params, k_x = jax.random.split(key)

    params = init_params(k_params, division, input_dim, hidden_dim_per_group)
    x = jax.random.normal(k_x, (batch, input_dim), jnp.float32)

    # bf16-weights fast path (weights prepared ONCE, reused across forwards).
    prepared_bf16 = prepare_params(params, compute_dtype=jnp.bfloat16)
    out = naive_parameters_classifier(x, prepared_bf16)
    out = jax.block_until_ready(out)
    assert out.shape == (batch, sum(division))

    # Matched-precision reference (bf16 matmul inputs, f32 accumulation) -> tight.
    ref_bf16 = reference_forward(x, params, compute_dtype=jnp.bfloat16)
    assert jnp.allclose(out, ref_bf16, atol=1e-3, rtol=1e-3)

    # Pure-f32 reference -> loose check that semantics are unchanged.
    ref_f32 = reference_forward(x, params, compute_dtype=jnp.float32)
    assert jnp.allclose(out, ref_f32, atol=5e-2, rtol=5e-2)

    # Full-precision kernel path against the f32 reference -> tight.
    prepared_f32 = prepare_params(params, compute_dtype=jnp.float32)
    out_f32 = naive_parameters_classifier(x, prepared_f32, batch_tile=16)
    out_f32 = jax.block_until_ready(out_f32)
    assert jnp.allclose(out_f32, ref_f32, atol=1e-5, rtol=1e-5)

    print("KERNEL_OK")
</pallas_src>

<mosaic_0001>
module attributes {stable_mosaic.version = 11 : i64} {
  func.func @classifier_kernel(%arg0: i32, %arg1: memref<32x32xf32, #tpu.memory_space<vmem>>, %arg2: memref<32x128xbf16, #tpu.memory_space<vmem>>, %arg3: memref<1x128xf32, #tpu.memory_space<vmem>>, %arg4: memref<128x128xbf16, #tpu.memory_space<vmem>>, %arg5: memref<1x128xf32, #tpu.memory_space<vmem>>, %arg6: memref<128x16xbf16, #tpu.memory_space<vmem>>, %arg7: memref<1x16xf32, #tpu.memory_space<vmem>>, %arg8: memref<32x16xf32, #tpu.memory_space<vmem>>) attributes {dimension_semantics = [#tpu.dimension_semantics<parallel>], iteration_bounds = array<i64: 2>, scalar_prefetch = 0 : i64, scratch_operands = 0 : i64, tpu.core_type = #tpu.core_type<tc>, window_params = [{transform_indices = @transform_0, window_bounds = array<i64: 32, 32>}, {pipeline_mode = #tpu.pipeline_mode<synchronous>, transform_indices = @transform_1, window_bounds = array<i64: 32, 128>}, {pipeline_mode = #tpu.pipeline_mode<synchronous>, transform_indices = @transform_2, window_bounds = array<i64: 1, 128>}, {pipeline_mode = #tpu.pipeline_mode<synchronous>, transform_indices = @transform_3, window_bounds = array<i64: 128, 128>}, {pipeline_mode = #tpu.pipeline_mode<synchronous>, transform_indices = @transform_4, window_bounds = array<i64: 1, 128>}, {pipeline_mode = #tpu.pipeline_mode<synchronous>, transform_indices = @transform_5, window_bounds = array<i64: 128, 16>}, {pipeline_mode = #tpu.pipeline_mode<synchronous>, transform_indices = @transform_6, window_bounds = array<i64: 1, 16>}, {transform_indices = @transform_7, window_bounds = array<i64: 32, 16>}]} {
    %c0 = arith.constant 0 : index
    %c0_0 = arith.constant 0 : index
    %0 = vector.load %arg1[%c0, %c0_0] : memref<32x32xf32, #tpu.memory_space<vmem>>, vector<32x32xf32>
    %1 = arith.truncf %0 : vector<32x32xf32> to vector<32x32xbf16>
    %c0_1 = arith.constant 0 : index
    %c0_2 = arith.constant 0 : index
    %2 = vector.load %arg2[%c0_1, %c0_2] : memref<32x128xbf16, #tpu.memory_space<vmem>>, vector<32x128xbf16>
    %cst = arith.constant dense<0.000000e+00> : vector<32x128xf32>
    %3 = tpu.matmul %1, %2, %cst {dimension_numbers = #tpu.dot_dimension_numbers<[1], [0], [0], [1], [0, 0, 1, 1], [], []>} : vector<32x32xbf16>, vector<32x128xbf16>, vector<32x128xf32> -> vector<32x128xf32>
    %c0_3 = arith.constant 0 : index
    %c0_4 = arith.constant 0 : index
    %4 = vector.load %arg3[%c0_3, %c0_4] : memref<1x128xf32, #tpu.memory_space<vmem>>, vector<1x128xf32>
    %5 = vector.broadcast %4 : vector<1x128xf32> to vector<32x128xf32>
    %6 = arith.addf %3, %5 : vector<32x128xf32>
    %cst_5 = arith.constant 0.000000e+00 : f32
    %7 = vector.broadcast %cst_5 : f32 to vector<32x128xf32>
    %8 = arith.cmpf ogt, %6, %7 : vector<32x128xf32>
    %cst_6 = arith.constant 0.00999999977 : f32
    %9 = vector.broadcast %cst_6 : f32 to vector<32x128xf32>
    %10 = arith.mulf %9, %6 : vector<32x128xf32>
    %11 = arith.select %8, %6, %10 : vector<32x128xi1>, vector<32x128xf32>
    %12 = arith.truncf %11 : vector<32x128xf32> to vector<32x128xbf16>
    %c0_7 = arith.constant 0 : index
    %c0_8 = arith.constant 0 : index
    %13 = vector.load %arg4[%c0_7, %c0_8] : memref<128x128xbf16, #tpu.memory_space<vmem>>, vector<128x128xbf16>
    %cst_9 = arith.constant dense<0.000000e+00> : vector<32x128xf32>
    %14 = tpu.matmul %12, %13, %cst_9 {dimension_numbers = #tpu.dot_dimension_numbers<[1], [0], [0], [1], [0, 0, 1, 1], [], []>} : vector<32x128xbf16>, vector<128x128xbf16>, vector<32x128xf32> -> vector<32x128xf32>
    %c0_10 = arith.constant 0 : index
    %c0_11 = arith.constant 0 : index
    %15 = vector.load %arg5[%c0_10, %c0_11] : memref<1x128xf32, #tpu.memory_space<vmem>>, vector<1x128xf32>
    %16 = vector.broadcast %15 : vector<1x128xf32> to vector<32x128xf32>
    %17 = arith.addf %14, %16 : vector<32x128xf32>
    %cst_12 = arith.constant 0.000000e+00 : f32
    %18 = vector.broadcast %cst_12 : f32 to vector<32x128xf32>
    %19 = arith.cmpf ogt, %17, %18 : vector<32x128xf32>
    %cst_13 = arith.constant 0.00999999977 : f32
    %20 = vector.broadcast %cst_13 : f32 to vector<32x128xf32>
    %21 = arith.mulf %20, %17 : vector<32x128xf32>
    %22 = arith.select %19, %17, %21 : vector<32x128xi1>, vector<32x128xf32>
    %23 = arith.truncf %22 : vector<32x128xf32> to vector<32x128xbf16>
    %c0_14 = arith.constant 0 : index
    %c0_15 = arith.constant 0 : index
    %24 = vector.load %arg6[%c0_14, %c0_15] : memref<128x16xbf16, #tpu.memory_space<vmem>>, vector<128x16xbf16>
    %cst_16 = arith.constant dense<0.000000e+00> : vector<32x16xf32>
    %25 = tpu.matmul %23, %24, %cst_16 {dimension_numbers = #tpu.dot_dimension_numbers<[1], [0], [0], [1], [0, 0, 1, 1], [], []>} : vector<32x128xbf16>, vector<128x16xbf16>, vector<32x16xf32> -> vector<32x16xf32>
    %c0_17 = arith.constant 0 : index
    %c0_18 = arith.constant 0 : index
    %26 = vector.load %arg7[%c0_17, %c0_18] : memref<1x16xf32, #tpu.memory_space<vmem>>, vector<1x16xf32>
    %27 = vector.broadcast %26 : vector<1x16xf32> to vector<32x16xf32>
    %28 = arith.addf %25, %27 : vector<32x16xf32>
    %c0_19 = arith.constant 0 : index
    %c0_20 = arith.constant 0 : index
    %29 = vector.load %arg8[%c0_19, %c0_20] : memref<32x16xf32, #tpu.memory_space<vmem>>, vector<32x16xf32>
    tpu.vector_store %arg8[%c0_19, %c0_20], %28 {strides = array<i32>} : memref<32x16xf32, #tpu.memory_space<vmem>>, vector<32x16xf32>,
    return
  }
  func.func @transform_0(%arg0: i32) -> (i32, i32) {
    %c0_i32 = arith.constant 0 : i32
    %c0_i32_0 = arith.constant 0 : i32
    return %arg0, %c0_i32 : i32, i32
  }
  func.func @transform_1(%arg0: i32) -> (i32, i32) {
    %c0_i32 = arith.constant 0 : i32
    %c0_i32_0 = arith.constant 0 : i32
    %c0_i32_1 = arith.constant 0 : i32
    return %c0_i32, %c0_i32_0 : i32, i32
  }
  func.func @transform_2(%arg0: i32) -> (i32, i32) {
    %c0_i32 = arith.constant 0 : i32
    %c0_i32_0 = arith.constant 0 : i32
    %c0_i32_1 = arith.constant 0 : i32
    return %c0_i32, %c0_i32_0 : i32, i32
  }
  func.func @transform_3(%arg0: i32) -> (i32, i32) {
    %c0_i32 = arith.constant 0 : i32
    %c0_i32_0 = arith.constant 0 : i32
    %c0_i32_1 = arith.constant 0 : i32
    return %c0_i32, %c0_i32_0 : i32, i32
  }
  func.func @transform_4(%arg0: i32) -> (i32, i32) {
    %c0_i32 = arith.constant 0 : i32
    %c0_i32_0 = arith.constant 0 : i32
    %c0_i32_1 = arith.constant 0 : i32
    return %c0_i32, %c0_i32_0 : i32, i32
  }
  func.func @transform_5(%arg0: i32) -> (i32, i32) {
    %c0_i32 = arith.constant 0 : i32
    %c0_i32_0 = arith.constant 0 : i32
    %c0_i32_1 = arith.constant 0 : i32
    return %c0_i32, %c0_i32_0 : i32, i32
  }
  func.func @transform_6(%arg0: i32) -> (i32, i32) {
    %c0_i32 = arith.constant 0 : i32
    %c0_i32_0 = arith.constant 0 : i32
    %c0_i32_1 = arith.constant 0 : i32
    return %c0_i32, %c0_i32_0 : i32, i32
  }
  func.func @transform_7(%arg0: i32) -> (i32, i32) {
    %c0_i32 = arith.constant 0 : i32
    %c0_i32_0 = arith.constant 0 : i32
    return %arg0, %c0_i32 : i32, i32
  }
}

module attributes {stable_mosaic.version = 11 : i64} {
  func.func @classifier_kernel(%arg0: i32, %arg1: memref<32x32xf32, #tpu.memory_space<vmem>>, %arg2: memref<32x128xbf16, #tpu.memory_space<vmem>>, %arg3: memref<1x128xf32, #tpu.memory_space<vmem>>, %arg4: memref<128x128xbf16, #tpu.memory_space<vmem>>, %arg5: memref<1x128xf32, #tpu.memory_space<vmem>>, %arg6: memref<128x16xbf16, #tpu.memory_space<vmem>>, %arg7: memref<1x16xf32, #tpu.memory_space<vmem>>, %arg8: memref<32x16xf32, #tpu.memory_space<vmem>>) attributes {dimension_semantics = [#tpu.dimension_semantics<parallel>], iteration_bounds = array<i64: 2>, scalar_prefetch = 0 : i64, scratch_operands = 0 : i64, tpu.core_type = #tpu.core_type<tc>, window_params = [{transform_indices = @transform_0, window_bounds = array<i64: 32, 32>}, {pipeline_mode = #tpu.pipeline_mode<synchronous>, transform_indices = @transform_1, window_bounds = array<i64: 32, 128>}, {pipeline_mode = #tpu.pipeline_mode<synchronous>, transform_indices = @transform_2, window_bounds = array<i64: 1, 128>}, {pipeline_mode = #tpu.pipeline_mode<synchronous>, transform_indices = @transform_3, window_bounds = array<i64: 128, 128>}, {pipeline_mode = #tpu.pipeline_mode<synchronous>, transform_indices = @transform_4, window_bounds = array<i64: 1, 128>}, {pipeline_mode = #tpu.pipeline_mode<synchronous>, transform_indices = @transform_5, window_bounds = array<i64: 128, 16>}, {pipeline_mode = #tpu.pipeline_mode<synchronous>, transform_indices = @transform_6, window_bounds = array<i64: 1, 16>}, {transform_indices = @transform_7, window_bounds = array<i64: 32, 16>}]} {
    %c0 = arith.constant 0 : index
    %c0_0 = arith.constant 0 : index
    %0 = vector.load %arg1[%c0, %c0_0] : memref<32x32xf32, #tpu.memory_space<vmem>>, vector<32x32xf32>
    %1 = arith.truncf %0 : vector<32x32xf32> to vector<32x32xbf16>
    %c0_1 = arith.constant 0 : index
    %c0_2 = arith.constant 0 : index
    %2 = vector.load %arg2[%c0_1, %c0_2] : memref<32x128xbf16, #tpu.memory_space<vmem>>, vector<32x128xbf16>
    %cst = arith.constant dense<0.000000e+00> : vector<32x128xf32>
    %3 = tpu.matmul %1, %2, %cst {dimension_numbers = #tpu.dot_dimension_numbers<[1], [0], [0], [1], [0, 0, 1, 1], [], []>} : vector<32x32xbf16>, vector<32x128xbf16>, vector<32x128xf32> -> vector<32x128xf32>
    %c0_3 = arith.constant 0 : index
    %c0_4 = arith.constant 0 : index
    %4 = vector.load %arg3[%c0_3, %c0_4] : memref<1x128xf32, #tpu.memory_space<vmem>>, vector<1x128xf32>
    %5 = vector.broadcast %4 : vector<1x128xf32> to vector<32x128xf32>
    %6 = arith.addf %3, %5 : vector<32x128xf32>
    %cst_5 = arith.constant 0.000000e+00 : f32
    %7 = vector.broadcast %cst_5 : f32 to vector<32x128xf32>
    %8 = arith.cmpf ogt, %6, %7 : vector<32x128xf32>
    %cst_6 = arith.constant 0.00999999977 : f32
    %9 = vector.broadcast %cst_6 : f32 to vector<32x128xf32>
    %10 = arith.mulf %9, %6 : vector<32x128xf32>
    %11 = arith.select %8, %6, %10 : vector<32x128xi1>, vector<32x128xf32>
    %12 = arith.truncf %11 : vector<32x128xf32> to vector<32x128xbf16>
    %c0_7 = arith.constant 0 : index
    %c0_8 = arith.constant 0 : index
    %13 = vector.load %arg4[%c0_7, %c0_8] : memref<128x128xbf16, #tpu.memory_space<vmem>>, vector<128x128xbf16>
    %cst_9 = arith.constant dense<0.000000e+00> : vector<32x128xf32>
    %14 = tpu.matmul %12, %13, %cst_9 {dimension_numbers = #tpu.dot_dimension_numbers<[1], [0], [0], [1], [0, 0, 1, 1], [], []>} : vector<32x128xbf16>, vector<128x128xbf16>, vector<32x128xf32> -> vector<32x128xf32>
    %c0_10 = arith.constant 0 : index
    %c0_11 = arith.constant 0 : index
    %15 = vector.load %arg5[%c0_10, %c0_11] : memref<1x128xf32, #tpu.memory_space<vmem>>, vector<1x128xf32>
    %16 = vector.broadcast %15 : vector<1x128xf32> to vector<32x128xf32>
    %17 = arith.addf %14, %16 : vector<32x128xf32>
    %cst_12 = arith.constant 0.000000e+00 : f32
    %18 = vector.broadcast %cst_12 : f32 to vector<32x128xf32>
    %19 = arith.cmpf ogt, %17, %18 : vector<32x128xf32>
    %cst_13 = arith.constant 0.00999999977 : f32
    %20 = vector.broadcast %cst_13 : f32 to vector<32x128xf32>
    %21 = arith.mulf %20, %17 : vector<32x128xf32>
    %22 = arith.select %19, %17, %21 : vector<32x128xi1>, vector<32x128xf32>
    %23 = arith.truncf %22 : vector<32x128xf32> to vector<32x128xbf16>
    %c0_14 = arith.constant 0 : index
    %c0_15 = arith.constant 0 : index
    %24 = vector.load %arg6[%c0_14, %c0_15] : memref<128x16xbf16, #tpu.memory_space<vmem>>, vector<128x16xbf16>
    %cst_16 = arith.constant dense<0.000000e+00> : vector<32x16xf32>
    %25 = tpu.matmul %23, %24, %cst_16 {dimension_numbers = #tpu.dot_dimension_numbers<[1], [0], [0], [1], [0, 0, 1, 1], [], []>} : vector<32x128xbf16>, vector<128x16xbf16>, vector<32x16xf32> -> vector<32x16xf32>
    %c0_17 = arith.constant 0 : index
    %c0_18 = arith.constant 0 : index
    %26 = vector.load %arg7[%c0_17, %c0_18] : memref<1x16xf32, #tpu.memory_space<vmem>>, vector<1x16xf32>
    %27 = vector.broadcast %26 : vector<1x16xf32> to vector<32x16xf32>
    %28 = arith.addf %25, %27 : vector<32x16xf32>
    %c0_19 = arith.constant 0 : index
    %c0_20 = arith.constant 0 : index
    %29 = vector.load %arg8[%c0_19, %c0_20] : memref<32x16xf32, #tpu.memory_space<vmem>>, vector<32x16xf32>
    tpu.vector_store %arg8[%c0_19, %c0_20], %28 {strides = array<i32>} : memref<32x16xf32, #tpu.memory_space<vmem>>, vector<32x16xf32>,
    return
  }
  func.func @transform_0(%arg0: i32) -> (i32, i32) {
    %c0_i32 = arith.constant 0 : i32
    %c0_i32_0 = arith.constant 0 : i32
    return %arg0, %c0_i32 : i32, i32
  }
  func.func @transform_1(%arg0: i32) -> (i32, i32) {
    %c0_i32 = arith.constant 0 : i32
    %c0_i32_0 = arith.constant 0 : i32
    %c0_i32_1 = arith.constant 0 : i32
    return %c0_i32, %c0_i32_0 : i32, i32
  }
  func.func @transform_2(%arg0: i32) -> (i32, i32) {
    %c0_i32 = arith.constant 0 : i32
    %c0_i32_0 = arith.constant 0 : i32
    %c0_i32_1 = arith.constant 0 : i32
    return %c0_i32, %c0_i32_0 : i32, i32
  }
  func.func @transform_3(%arg0: i32) -> (i32, i32) {
    %c0_i32 = arith.constant 0 : i32
    %c0_i32_0 = arith.constant 0 : i32
    %c0_i32_1 = arith.constant 0 : i32
    return %c0_i32, %c0_i32_0 : i32, i32
  }
  func.func @transform_4(%arg0: i32) -> (i32, i32) {
    %c0_i32 = arith.constant 0 : i32
    %c0_i32_0 = arith.constant 0 : i32
    %c0_i32_1 = arith.constant 0 : i32
    return %c0_i32, %c0_i32_0 : i32, i32
  }
  func.func @transform_5(%arg0: i32) -> (i32, i32) {
    %c0_i32 = arith.constant 0 : i32
    %c0_i32_0 = arith.constant 0 : i32
    %c0_i32_1 = arith.constant 0 : i32
    return %c0_i32, %c0_i32_0 : i32, i32
  }
  func.func @transform_6(%arg0: i32) -> (i32, i32) {
    %c0_i32 = arith.constant 0 : i32
    %c0_i32_0 = arith.constant 0 : i32
    %c0_i32_1 = arith.constant 0 : i32
    return %c0_i32, %c0_i32_0 : i32, i32
  }
  func.func @transform_7(%arg0: i32) -> (i32, i32) {
    %c0_i32 = arith.constant 0 : i32
    %c0_i32_0 = arith.constant 0 : i32
    return %arg0, %c0_i32 : i32, i32
  }
}

</mosaic_0001>

<bundles_post_ra>
// kernel: tpu_custom_call.1
= control target key start
LH: loop header
LB: loop body
LE: loop exit
PB: predicated region body
PF: predicated region fallthrough
CT: control target
= control target key end

     0   :  { %s877_s24 = smov 0   ;;  %s964_s0 = inlined_call_operand.vmem [shape: f32[64,32], index: 0, kind: input, shape index: {}]   ;;  %s965_s1 = inlined_call_operand.vmem [shape: bf16[32,128], index: 1, kind: input, shape index: {}]   ;;  %s966_s2 = inlined_call_operand.vmem [shape: f32[1,128], index: 2, kind: input, shape index: {}]   ;;  %s967_s3 = inlined_call_operand.vmem [shape: bf16[128,128], index: 3, kind: input, shape index: {}]   ;;  %s968_s4 = inlined_call_operand.vmem [shape: f32[1,128], index: 4, kind: input, shape index: {}]   ;;  %s969_s5 = inlined_call_operand.vmem [shape: bf16[128,16], index: 5, kind: input, shape index: {}]   ;;  %s970_s6 = inlined_call_operand.vmem [shape: f32[1,16], index: 6, kind: input, shape index: {}]   ;;  %s971_s7 = inlined_call_operand.vmem [shape: f32[64,16], index: 7, kind: output, shape index: {}]  }
   0x1 LB: > { %s697_s25 = sadd.s32 4294967295, %s835_s24   ;;  %p701_p0 = scmp.ge.s32.totalorder %s835_s24, 1  ;;  %s835_s24 = sphi %s877_s24, %s17_s24  }
   0x2   : > { %p238_p1 = scmp.lt.s32.totalorder %s835_s24, 3 }
   0x4   : > { %p239_p2 = pnand %p701_p0, %p238_p1 }
   0x5   : > { %v811_v0 = vld [vmem:[%s965_s1] sm:$0xff] (!%p239_p2)   ;;  %s702_s28 = sshll.u32 (!%p239_p2), %s697_s25, 2  ;;  %v812_v1 = vld [vmem:[%s965_s1 + $0x8] sm:$0xff] (!%p239_p2)   ;;  %v815_v4 = vld [vmem:[%s967_s3 + $0x10] sm:$0xff] (!%p239_p2)   ;;  %vm312_vm0 = vcmask (!%p239_p2), 261120   ;;  %vm636_vm9 = vcmask (!%p239_p2), 130048  }
   0x6   : > { %242 = sbr.rel (%p239_p2) target bundleno = 684 (0x2ac), region = 48  ;;  %p271_p3 = scmp.lt.s32.totalorder (!%p239_p2), %s702_s28, 7  ;;  %755 = vmatprep.subr.bf16.mxu0 (!%p239_p2), %v811_v0  ;;  %v813_v2 = vld [vmem:[%s967_s3] sm:$0xff] (!%p239_p2)   ;;  %v814_v3 = vld [vmem:[%s967_s3 + $0x8] sm:$0xff] (!%p239_p2)   ;;  %v816_v10 = vld [vmem:[%s967_s3 + $0x18] sm:$0xff] (!%p239_p2)  }
   0x7   : > { %756 = vmatpush3.bf16.msra.mxu0 (!%p239_p2), %v811_v0  ;;  %763 = vmatprep.subr.bf16.mxu1 (!%p239_p2), %v813_v2  ;;  %v817_v12 = vld [vmem:[%s967_s3 + $0x20] sm:$0xff] (!%p239_p2)   ;;  %v818_v13 = vld [vmem:[%s967_s3 + $0x28] sm:$0xff] (!%p239_p2)   ;;  %v819_v14 = vld [vmem:[%s967_s3 + $0x30] sm:$0xff] (!%p239_p2)  }
   0x8   : > { %757 = vmatprep.subr.bf16.mxu0 (!%p239_p2), %v812_v1  ;;  %764 = vmatpush3.bf16.msra.mxu1 (!%p239_p2), %v813_v2  ;;  %v820_v15 = vld [vmem:[%s967_s3 + $0x38] sm:$0xff] (!%p239_p2)   ;;  %v821_v16 = vld [vmem:[%s969_s5] sm:$0xff] (!%p239_p2)   ;;  %v822_v17 = vld [vmem:[%s969_s5 + $0x8] sm:$0xff] (!%p239_p2)  }
   0x9   : > { %765 = vmatprep.subr.bf16.mxu1 (!%p239_p2), %v814_v3  ;;  %v823_v18 = vld [vmem:[%s969_s5 + $0x10] sm:$0xff] (!%p239_p2)   ;;  %v824_v19 = vld [vmem:[%s969_s5 + $0x18] sm:$0xff] (!%p239_p2)   ;;  %v825_v20 = vld [vmem:[%s969_s5 + $0x20] sm:$0xff] (!%p239_p2)  }
   0xa   : > { %v706_v21 = vld [vmem:[%s966_s2] ss:$0 sm:$0xff] (!%p239_p2)  ;;  %v826_v40 = vld [vmem:[%s969_s5 + $0x28] sm:$0xff] (!%p239_p2)   ;;  %v827_v41 = vld [vmem:[%s969_s5 + $0x30] sm:$0xff] (!%p239_p2)  }
   0xb   : > { %758 = vmatpush3.bf16.msra.mxu0 (!%p239_p2), %v812_v1  ;;  %v828_v42 = vld [vmem:[%s969_s5 + $0x38] sm:$0xff] (!%p239_p2)   ;;  %v711_v43 = vld [vmem:[%s968_s4] ss:$0 sm:$0xff] (!%p239_p2) }
   0xc   : > { %766 = vmatpush3.bf16.msra.mxu1 (!%p239_p2), %v814_v3  ;;  %783 = vmatprep.subr.bf16.mxu0 (!%p239_p2), %v821_v16  ;;  %v720_v62 = vld [vmem:[%s970_s6] ss:$0 sm:$0xff] (!%p239_p2) }
   0xd   : > { %s973_s28 = smov (!%p271_p3, %s702_s28), 7  ;;  %767 = vmatprep.subr.bf16.mxu1 %v815_v4 }
   0xe   : > { %s703_s12 = sshll.u32 %s973_s28, 3 }
   0xf   : > { %s274_s15 = scalar_lea.vmem %s964_s0, %s703_s12  ;;  %s280_s11 = scalar_lea.vmem %s971_s7, %s703_s12 }
  0x10   : > { %v283_v5 = vld [vmem:[%s274_s15] sm:$0xff]  ;;  %v284_v6 = vld [vmem:[%s274_s15 + $0x8] sm:$0xff]  ;;  %v285_v7 = vld [vmem:[%s274_s15 + $0x10] sm:$0xff]  ;;  %768 = vmatpush3.bf16.msra.mxu1 %v815_v4 }
  0x11   : > { %v287_v8 = vpack.c.bf16 %v284_v6, %v283_v5  ;;  %v286_v9 = vld [vmem:[%s274_s15 + $0x18] sm:$0xff]  ;;  %769 = vmatprep.subr.bf16.mxu1 %v816_v10 }
  0x12   : > { %v288_v11 = vpack.c.bf16 %v286_v9, %v285_v7 }
  0x13   : > { %759 = vmatprep.mubr.msk.bf16.mxu0 %vm312_vm0, %v287_v8 }
  0x14   : > { %760 = vmatmul.mubr.msk.bf16.vlgmr.msra.gmra.mrb[0].mxu0 %vm312_vm0, %v288_v11  ;;  %770 = vmatpush3.bf16.msra.mxu1 %v816_v10 }
  0x15   : > { %771 = vmatprep.subr.bf16.mxu1 %v817_v12  ;;  %784 = vmatpush3.bf16.msra.mxu0 %v821_v16 }
  0x16   : > { %785 = vmatprep.subr.bf16.mxu0 %v822_v17 }
  0x18   : > { %772 = vmatpush3.bf16.msra.mxu1 %v817_v12 }
  0x19   : > { %773 = vmatprep.subr.bf16.mxu1 %v818_v13  ;;  %786 = vmatpush3.bf16.msra.mxu0 %v822_v17 }
  0x1a   : > { %787 = vmatprep.subr.bf16.mxu0 %v823_v18 }
  0x1c   : > { %774 = vmatpush3.bf16.msra.mxu1 %v818_v13 }
  0x1d   : > { %775 = vmatprep.subr.bf16.mxu1 %v819_v14  ;;  %788 = vmatpush3.bf16.msra.mxu0 %v823_v18 }
  0x1e   : > { %789 = vmatprep.subr.bf16.mxu0 %v824_v19 }
  0x20   : > { %776 = vmatpush3.bf16.msra.mxu1 %v819_v14 }
  0x21   : > { %777 = vmatprep.subr.bf16.mxu1 %v820_v15  ;;  %790 = vmatpush3.bf16.msra.mxu0 %v824_v19 }
  0x22   : > { %791 = vmatprep.subr.bf16.mxu0 %v825_v20 }
  0x24   : > { %778 = vmatpush3.bf16.msra.mxu1 %v820_v15 }
  0x25   : > { %792 = vmatpush3.bf16.msra.mxu0 %v825_v20 }
  0x26   : > { %793 = vmatprep.subr.bf16.mxu0 %v826_v40 }
  0x29   : > { %794 = vmatpush3.bf16.msra.mxu0 %v826_v40 }
  0x2a   : > { %795 = vmatprep.subr.bf16.mxu0 %v827_v41 }
  0x2d   : > { %796 = vmatpush3.bf16.msra.mxu0 %v827_v41 }
  0x2e   : > { %797 = vmatprep.subr.bf16.mxu0 %v828_v42 }
  0x31   : > { %798 = vmatpush3.bf16.msra.mxu0 %v828_v42 }
  0xe7   : > { %v761_v22 = vpop.f32.mrb[0].mxu0 }
  0xe8   : > { %v362_v23 = vadd.f32 %v761_v22, %v706_v21  ;;  %v353_v24 = vpop.f32.mrb[1].mxu0 }
  0xe9   : > { %v354_v25 = vadd.f32 %v706_v21, %v353_v24  ;;  %v762_v26 = vpop.f32.mrb[2].mxu0 }
  0xea   : > { %v374_v27 = vmul.f32 0.01, %v362_v23  ;;  %v365_v28 = vadd.f32 %v762_v26, %v706_v21  ;;  %v356_v29 = vpop.f32.mrb[3].mxu0  ;;  %vm370_vm1 = vcmp.gt.f32.partialorder %v362_v23, 0.0 }
  0xeb   : > { %v372_v30 = vmul.f32 0.01, %v354_v25  ;;  %v357_v31 = vadd.f32 %v706_v21, %v356_v29  ;;  %vm368_vm3 = vcmp.gt.f32.partialorder %v354_v25, 0.0 }
  0xec   : > { %vm371_vm2 = vcmp.gt.f32.partialorder %v365_v28, 0.0  ;;  %v375_v32 = vmul.f32 0.01, %v365_v28  ;;  %v378_v34 = vsel %vm370_vm1, %v362_v23, %v374_v27 }
  0xed   : > { %v373_v33 = vmul.f32 0.01, %v357_v31  ;;  %vm369_vm4 = vcmp.gt.f32.partialorder %v357_v31, 0.0  ;;  %v376_v36 = vsel %vm368_vm3, %v354_v25, %v372_v30 }
  0xee   : > { %v379_v35 = vsel %vm371_vm2, %v365_v28, %v375_v32 }
  0xef   : > { %v377_v37 = vsel %vm369_vm4, %v357_v31, %v373_v33  ;;  %v381_v38 = vpack.c.bf16 %v379_v35, %v378_v34 }
  0xf0   : > { %v380_v39 = vpack.c.bf16 %v377_v37, %v376_v36 }
  0xf2   : > { %779 = vmatprep.mubr.bf16.mxu1 %v380_v39 }
  0xf3   : > { %780 = vmatmul.mubr.bf16.vlgmr.msra.gmra.mrb[0].mxu1 %v381_v38 }
 0x1c6   : > { %v781_v44 = vpop.f32.mrb[0].mxu1 }
 0x1c7   : > { %v496_v45 = vadd.f32 %v781_v44, %v711_v43  ;;  %v487_v46 = vpop.f32.mrb[1].mxu1 }
 0x1c8   : > { %v488_v47 = vadd.f32 %v711_v43, %v487_v46  ;;  %v782_v48 = vpop.f32.mrb[2].mxu1 }
 0x1c9   : > { %v508_v49 = vmul.f32 0.01, %v496_v45  ;;  %v499_v50 = vadd.f32 %v782_v48, %v711_v43  ;;  %v490_v51 = vpop.f32.mrb[3].mxu1  ;;  %vm504_vm5 = vcmp.gt.f32.partialorder %v496_v45, 0.0 }
 0x1ca   : > { %v506_v52 = vmul.f32 0.01, %v488_v47  ;;  %v491_v53 = vadd.f32 %v711_v43, %v490_v51  ;;  %vm502_vm6 = vcmp.gt.f32.partialorder %v488_v47, 0.0 }
 0x1cb   : > { %vm505_vm7 = vcmp.gt.f32.partialorder %v499_v50, 0.0  ;;  %v509_v54 = vmul.f32 0.01, %v499_v50  ;;  %v512_v56 = vsel %vm504_vm5, %v496_v45, %v508_v49 }
 0x1cc   : > { %vm503_vm8 = vcmp.gt.f32.partialorder %v491_v53, 0.0  ;;  %v507_v55 = vmul.f32 0.01, %v491_v53  ;;  %v510_v59 = vsel %vm502_vm6, %v488_v47, %v506_v52 }
 0x1cd   : > { %v513_v57 = vsel %vm505_vm7, %v499_v50, %v509_v54 }
 0x1ce   : > { %v515_v58 = vpack.c.bf16 %v513_v57, %v512_v56  ;;  %v511_v60 = vsel %vm503_vm8, %v491_v53, %v507_v55 }
 0x1cf   : > { %v514_v61 = vpack.c.bf16 %v511_v60, %v510_v59 }
 0x1d1   : > { %799 = vmatprep.mubr.bf16.mxu0 %v514_v61 }
 0x1d2   : > { %800 = vmatmul.mubr.bf16.vlgmr.msra.gmra.mrb[4].mxu0 %v515_v58 }
 0x2a5   : > { %v801_v63 = vpop.f32.mrb[4].mxu0 }
 0x2a6   : > { %v621_v0 = vpop.f32.mrb[5].mxu0  ;;  %v630_v5 = vadd.f32 %v801_v63, %v720_v62 }
 0x2a7   : > { %v622_v1 = vadd.f32 %v720_v62, %v621_v0  ;;  %v802_v2 = vpop.f32.mrb[6].mxu0 }
 0x2a8   : > { %v624_v3 = vpop.f32.mrb[7].mxu0  ;;  %v633_v6 = vadd.f32 %v802_v2, %v720_v62  ;;  %639 = vst.msk [vmem:[%s280_s11 + $0x10] sm:$0xff] %vm636_vm9, %v630_v5 }
 0x2a9   : > { %637 = vst.msk [vmem:[%s280_s11] sm:$0xff] %vm636_vm9, %v622_v1  ;;  %v625_v4 = vadd.f32 %v720_v62, %v624_v3 }
 0x2aa   : > { %640 = vst.msk [vmem:[%s280_s11 + $0x18] sm:$0xff] %vm636_vm9, %v633_v6 }
 0x2ab   : > { %638 = vst.msk [vmem:[%s280_s11 + $0x8] sm:$0xff] %vm636_vm9, %v625_v4 }
 0x2ac PF: > { %s17_s24 = sadd.s32 1, %s835_s24  }
 0x2ad   : > { %p14_p4 = scmp.ge.s32.totalorder %s17_s24, 4  }
 0x2af   :  { %16 = sbr.rel (!%p14_p4) target bundleno = 1 (0x1), region = 78 }

// kernel: tpu_custom_call.1
= control target key start
LH: loop header
LB: loop body
LE: loop exit
PB: predicated region body
PF: predicated region fallthrough
CT: control target
= control target key end

     0   :  { %s877_s24 = smov 0   ;;  %s964_s0 = inlined_call_operand.vmem [shape: f32[64,32], index: 0, kind: input, shape index: {}]   ;;  %s965_s1 = inlined_call_operand.vmem [shape: bf16[32,128], index: 1, kind: input, shape index: {}]   ;;  %s966_s2 = inlined_call_operand.vmem [shape: f32[1,128], index: 2, kind: input, shape index: {}]   ;;  %s967_s3 = inlined_call_operand.vmem [shape: bf16[128,128], index: 3, kind: input, shape index: {}]   ;;  %s968_s4 = inlined_call_operand.vmem [shape: f32[1,128], index: 4, kind: input, shape index: {}]   ;;  %s969_s5 = inlined_call_operand.vmem [shape: bf16[128,16], index: 5, kind: input, shape index: {}]   ;;  %s970_s6 = inlined_call_operand.vmem [shape: f32[1,16], index: 6, kind: input, shape index: {}]   ;;  %s971_s7 = inlined_call_operand.vmem [shape: f32[64,16], index: 7, kind: output, shape index: {}]  }
   0x1 LB: > { %s697_s25 = sadd.s32 4294967295, %s835_s24   ;;  %p701_p0 = scmp.ge.s32.totalorder %s835_s24, 1  ;;  %s835_s24 = sphi %s877_s24, %s17_s24  }
   0x2   : > { %p238_p1 = scmp.lt.s32.totalorder %s835_s24, 3 }
   0x4   : > { %p239_p2 = pnand %p701_p0, %p238_p1 }
   0x5   : > { %v811_v0 = vld [vmem:[%s965_s1] sm:$0xff] (!%p239_p2)   ;;  %s702_s28 = sshll.u32 (!%p239_p2), %s697_s25, 2  ;;  %v812_v1 = vld [vmem:[%s965_s1 + $0x8] sm:$0xff] (!%p239_p2)   ;;  %v815_v4 = vld [vmem:[%s967_s3 + $0x10] sm:$0xff] (!%p239_p2)   ;;  %vm312_vm0 = vcmask (!%p239_p2), 261120   ;;  %vm636_vm9 = vcmask (!%p239_p2), 130048  }
   0x6   : > { %242 = sbr.rel (%p239_p2) target bundleno = 684 (0x2ac), region = 48  ;;  %p271_p3 = scmp.lt.s32.totalorder (!%p239_p2), %s702_s28, 7  ;;  %755 = vmatprep.subr.bf16.mxu0 (!%p239_p2), %v811_v0  ;;  %v813_v2 = vld [vmem:[%s967_s3] sm:$0xff] (!%p239_p2)   ;;  %v814_v3 = vld [vmem:[%s967_s3 + $0x8] sm:$0xff] (!%p239_p2)   ;;  %v816_v10 = vld [vmem:[%s967_s3 + $0x18] sm:$0xff] (!%p239_p2)  }
   0x7   : > { %756 = vmatpush3.bf16.msra.mxu0 (!%p239_p2), %v811_v0  ;;  %763 = vmatprep.subr.bf16.mxu1 (!%p239_p2), %v813_v2  ;;  %v817_v12 = vld [vmem:[%s967_s3 + $0x20] sm:$0xff] (!%p239_p2)   ;;  %v818_v13 = vld [vmem:[%s967_s3 + $0x28] sm:$0xff] (!%p239_p2)   ;;  %v819_v14 = vld [vmem:[%s967_s3 + $0x30] sm:$0xff] (!%p239_p2)  }
   0x8   : > { %757 = vmatprep.subr.bf16.mxu0 (!%p239_p2), %v812_v1  ;;  %764 = vmatpush3.bf16.msra.mxu1 (!%p239_p2), %v813_v2  ;;  %v820_v15 = vld [vmem:[%s967_s3 + $0x38] sm:$0xff] (!%p239_p2)   ;;  %v821_v16 = vld [vmem:[%s969_s5] sm:$0xff] (!%p239_p2)   ;;  %v822_v17 = vld [vmem:[%s969_s5 + $0x8] sm:$0xff] (!%p239_p2)  }
   0x9   : > { %765 = vmatprep.subr.bf16.mxu1 (!%p239_p2), %v814_v3  ;;  %v823_v18 = vld [vmem:[%s969_s5 + $0x10] sm:$0xff] (!%p239_p2)   ;;  %v824_v19 = vld [vmem:[%s969_s5 + $0x18] sm:$0xff] (!%p239_p2)   ;;  %v825_v20 = vld [vmem:[%s969_s5 + $0x20] sm:$0xff] (!%p239_p2)  }
   0xa   : > { %v706_v21 = vld [vmem:[%s966_s2] ss:$0 sm:$0xff] (!%p239_p2)  ;;  %v826_v40 = vld [vmem:[%s969_s5 + $0x28] sm:$0xff] (!%p239_p2)   ;;  %v827_v41 = vld [vmem:[%s969_s5 + $0x30] sm:$0xff] (!%p239_p2)  }
   0xb   : > { %758 = vmatpush3.bf16.msra.mxu0 (!%p239_p2), %v812_v1  ;;  %v828_v42 = vld [vmem:[%s969_s5 + $0x38] sm:$0xff] (!%p239_p2)   ;;  %v711_v43 = vld [vmem:[%s968_s4] ss:$0 sm:$0xff] (!%p239_p2) }
   0xc   : > { %766 = vmatpush3.bf16.msra.mxu1 (!%p239_p2), %v814_v3  ;;  %783 = vmatprep.subr.bf16.mxu0 (!%p239_p2), %v821_v16  ;;  %v720_v62 = vld [vmem:[%s970_s6] ss:$0 sm:$0xff] (!%p239_p2) }
   0xd   : > { %s973_s28 = smov (!%p271_p3, %s702_s28), 7  ;;  %767 = vmatprep.subr.bf16.mxu1 %v815_v4 }
   0xe   : > { %s703_s12 = sshll.u32 %s973_s28, 3 }
   0xf   : > { %s274_s15 = scalar_lea.vmem %s964_s0, %s703_s12  ;;  %s280_s11 = scalar_lea.vmem %s971_s7, %s703_s12 }
  0x10   : > { %v283_v5 = vld [vmem:[%s274_s15] sm:$0xff]  ;;  %v284_v6 = vld [vmem:[%s274_s15 + $0x8] sm:$0xff]  ;;  %v285_v7 = vld [vmem:[%s274_s15 + $0x10] sm:$0xff]  ;;  %768 = vmatpush3.bf16.msra.mxu1 %v815_v4 }
  0x11   : > { %v287_v8 = vpack.c.bf16 %v284_v6, %v283_v5  ;;  %v286_v9 = vld [vmem:[%s274_s15 + $0x18] sm:$0xff]  ;;  %769 = vmatprep.subr.bf16.mxu1 %v816_v10 }
  0x12   : > { %v288_v11 = vpack.c.bf16 %v286_v9, %v285_v7 }
  0x13   : > { %759 = vmatprep.mubr.msk.bf16.mxu0 %vm312_vm0, %v287_v8 }
  0x14   : > { %760 = vmatmul.mubr.msk.bf16.vlgmr.msra.gmra.mrb[0].mxu0 %vm312_vm0, %v288_v11  ;;  %770 = vmatpush3.bf16.msra.mxu1 %v816_v10 }
  0x15   : > { %771 = vmatprep.subr.bf16.mxu1 %v817_v12  ;;  %784 = vmatpush3.bf16.msra.mxu0 %v821_v16 }
  0x16   : > { %785 = vmatprep.subr.bf16.mxu0 %v822_v17 }
  0x18   : > { %772 = vmatpush3.bf16.msra.mxu1 %v817_v12 }
  0x19   : > { %773 = vmatprep.subr.bf16.mxu1 %v818_v13  ;;  %786 = vmatpush3.bf16.msra.mxu0 %v822_v17 }
  0x1a   : > { %787 = vmatprep.subr.bf16.mxu0 %v823_v18 }
  0x1c   : > { %774 = vmatpush3.bf16.msra.mxu1 %v818_v13 }
  0x1d   : > { %775 = vmatprep.subr.bf16.mxu1 %v819_v14  ;;  %788 = vmatpush3.bf16.msra.mxu0 %v823_v18 }
  0x1e   : > { %789 = vmatprep.subr.bf16.mxu0 %v824_v19 }
  0x20   : > { %776 = vmatpush3.bf16.msra.mxu1 %v819_v14 }
  0x21   : > { %777 = vmatprep.subr.bf16.mxu1 %v820_v15  ;;  %790 = vmatpush3.bf16.msra.mxu0 %v824_v19 }
  0x22   : > { %791 = vmatprep.subr.bf16.mxu0 %v825_v20 }
  0x24   : > { %778 = vmatpush3.bf16.msra.mxu1 %v820_v15 }
  0x25   : > { %792 = vmatpush3.bf16.msra.mxu0 %v825_v20 }
  0x26   : > { %793 = vmatprep.subr.bf16.mxu0 %v826_v40 }
  0x29   : > { %794 = vmatpush3.bf16.msra.mxu0 %v826_v40 }
  0x2a   : > { %795 = vmatprep.subr.bf16.mxu0 %v827_v41 }
  0x2d   : > { %796 = vmatpush3.bf16.msra.mxu0 %v827_v41 }
  0x2e   : > { %797 = vmatprep.subr.bf16.mxu0 %v828_v42 }
  0x31   : > { %798 = vmatpush3.bf16.msra.mxu0 %v828_v42 }
  0xe7   : > { %v761_v22 = vpop.f32.mrb[0].mxu0 }
  0xe8   : > { %v362_v23 = vadd.f32 %v761_v22, %v706_v21  ;;  %v353_v24 = vpop.f32.mrb[1].mxu0 }
  0xe9   : > { %v354_v25 = vadd.f32 %v706_v21, %v353_v24  ;;  %v762_v26 = vpop.f32.mrb[2].mxu0 }
  0xea   : > { %v374_v27 = vmul.f32 0.01, %v362_v23  ;;  %v365_v28 = vadd.f32 %v762_v26, %v706_v21  ;;  %v356_v29 = vpop.f32.mrb[3].mxu0  ;;  %vm370_vm1 = vcmp.gt.f32.partialorder %v362_v23, 0.0 }
  0xeb   : > { %v372_v30 = vmul.f32 0.01, %v354_v25  ;;  %v357_v31 = vadd.f32 %v706_v21, %v356_v29  ;;  %vm368_vm3 = vcmp.gt.f32.partialorder %v354_v25, 0.0 }
  0xec   : > { %vm371_vm2 = vcmp.gt.f32.partialorder %v365_v28, 0.0  ;;  %v375_v32 = vmul.f32 0.01, %v365_v28  ;;  %v378_v34 = vsel %vm370_vm1, %v362_v23, %v374_v27 }
  0xed   : > { %v373_v33 = vmul.f32 0.01, %v357_v31  ;;  %vm369_vm4 = vcmp.gt.f32.partialorder %v357_v31, 0.0  ;;  %v376_v36 = vsel %vm368_vm3, %v354_v25, %v372_v30 }
  0xee   : > { %v379_v35 = vsel %vm371_vm2, %v365_v28, %v375_v32 }
  0xef   : > { %v377_v37 = vsel %vm369_vm4, %v357_v31, %v373_v33  ;;  %v381_v38 = vpack.c.bf16 %v379_v35, %v378_v34 }
  0xf0   : > { %v380_v39 = vpack.c.bf16 %v377_v37, %v376_v36 }
  0xf2   : > { %779 = vmatprep.mubr.bf16.mxu1 %v380_v39 }
  0xf3   : > { %780 = vmatmul.mubr.bf16.vlgmr.msra.gmra.mrb[0].mxu1 %v381_v38 }
 0x1c6   : > { %v781_v44 = vpop.f32.mrb[0].mxu1 }
 0x1c7   : > { %v496_v45 = vadd.f32 %v781_v44, %v711_v43  ;;  %v487_v46 = vpop.f32.mrb[1].mxu1 }
 0x1c8   : > { %v488_v47 = vadd.f32 %v711_v43, %v487_v46  ;;  %v782_v48 = vpop.f32.mrb[2].mxu1 }
 0x1c9   : > { %v508_v49 = vmul.f32 0.01, %v496_v45  ;;  %v499_v50 = vadd.f32 %v782_v48, %v711_v43  ;;  %v490_v51 = vpop.f32.mrb[3].mxu1  ;;  %vm504_vm5 = vcmp.gt.f32.partialorder %v496_v45, 0.0 }
 0x1ca   : > { %v506_v52 = vmul.f32 0.01, %v488_v47  ;;  %v491_v53 = vadd.f32 %v711_v43, %v490_v51  ;;  %vm502_vm6 = vcmp.gt.f32.partialorder %v488_v47, 0.0 }
 0x1cb   : > { %vm505_vm7 = vcmp.gt.f32.partialorder %v499_v50, 0.0  ;;  %v509_v54 = vmul.f32 0.01, %v499_v50  ;;  %v512_v56 = vsel %vm504_vm5, %v496_v45, %v508_v49 }
 0x1cc   : > { %vm503_vm8 = vcmp.gt.f32.partialorder %v491_v53, 0.0  ;;  %v507_v55 = vmul.f32 0.01, %v491_v53  ;;  %v510_v59 = vsel %vm502_vm6, %v488_v47, %v506_v52 }
 0x1cd   : > { %v513_v57 = vsel %vm505_vm7, %v499_v50, %v509_v54 }
 0x1ce   : > { %v515_v58 = vpack.c.bf16 %v513_v57, %v512_v56  ;;  %v511_v60 = vsel %vm503_vm8, %v491_v53, %v507_v55 }
 0x1cf   : > { %v514_v61 = vpack.c.bf16 %v511_v60, %v510_v59 }
 0x1d1   : > { %799 = vmatprep.mubr.bf16.mxu0 %v514_v61 }
 0x1d2   : > { %800 = vmatmul.mubr.bf16.vlgmr.msra.gmra.mrb[4].mxu0 %v515_v58 }
 0x2a5   : > { %v801_v63 = vpop.f32.mrb[4].mxu0 }
 0x2a6   : > { %v621_v0 = vpop.f32.mrb[5].mxu0  ;;  %v630_v5 = vadd.f32 %v801_v63, %v720_v62 }
 0x2a7   : > { %v622_v1 = vadd.f32 %v720_v62, %v621_v0  ;;  %v802_v2 = vpop.f32.mrb[6].mxu0 }
 0x2a8   : > { %v624_v3 = vpop.f32.mrb[7].mxu0  ;;  %v633_v6 = vadd.f32 %v802_v2, %v720_v62  ;;  %639 = vst.msk [vmem:[%s280_s11 + $0x10] sm:$0xff] %vm636_vm9, %v630_v5 }
 0x2a9   : > { %637 = vst.msk [vmem:[%s280_s11] sm:$0xff] %vm636_vm9, %v622_v1  ;;  %v625_v4 = vadd.f32 %v720_v62, %v624_v3 }
 0x2aa   : > { %640 = vst.msk [vmem:[%s280_s11 + $0x18] sm:$0xff] %vm636_vm9, %v633_v6 }
 0x2ab   : > { %638 = vst.msk [vmem:[%s280_s11 + $0x8] sm:$0xff] %vm636_vm9, %v625_v4 }
 0x2ac PF: > { %s17_s24 = sadd.s32 1, %s835_s24  }
 0x2ad   : > { %p14_p4 = scmp.ge.s32.totalorder %s17_s24, 4  }
 0x2af   :  { %16 = sbr.rel (!%p14_p4) target bundleno = 1 (0x1), region = 78 }

</bundles_post_ra>
